<compile_context>
chip_gen: v7x
topology: tpu7x:2x2x1
jax: 0.10.0
libtpu: 0.0.40
codegen_flags: <defaults>
</compile_context>

<pallas_src>
import functools

import jax
import jax.numpy as jnp
from jax.experimental import pallas as pl
from jax.experimental.pallas import tpu as pltpu


def _largest_divisor_leq(n, cap):
    for c in range(min(n, cap), 0, -1):
        if n % c == 0:
            return c
    return 1


# ---------------------------------------------------------------------------
# Kernel 1: per-head linear projection  y_h = x @ W_h + b_h  (head-major out)
# ---------------------------------------------------------------------------
def _proj_kernel(x_ref, w_ref, b_ref, o_ref):
    y = jnp.dot(x_ref[...], w_ref[...], preferred_element_type=jnp.float32)
    o_ref[...] = (y + b_ref[...]).astype(o_ref.dtype)


def _project_heads(x2d, w_heads, b_heads, out_dtype):
    m, d_model = x2d.shape
    n_head, _, d_out = w_heads.shape
    tm = min(m, 256)                       # row tile (full M if small)
    grid = (pl.cdiv(m, tm), n_head)        # rows outer (x block reused over h)
    return pl.pallas_call(
        _proj_kernel,
        grid=grid,
        out_shape=jax.ShapeDtypeStruct((n_head, m, d_out), out_dtype),
        in_specs=[
            pl.BlockSpec((tm, d_model), lambda r, h: (r, 0)),
            pl.BlockSpec((None, d_model, d_out), lambda r, h: (h, 0, 0)),
            pl.BlockSpec((None, 1, d_out), lambda r, h: (h, 0, 0)),
        ],
        out_specs=pl.BlockSpec((None, tm, d_out), lambda r, h: (h, r, 0)),
        compiler_params=pltpu.CompilerParams(
            dimension_semantics=("parallel", "arbitrary")),
    )(x2d, w_heads, b_heads)


# ---------------------------------------------------------------------------
# Kernel 2: scaled dot-product attention, GH*GB (head, batch) slices per step
# ---------------------------------------------------------------------------
def _attention_kernel(q_ref, k_ref, v_ref, m_ref, o_ref, a_ref, *, inv_temperature):
    gh, gb, lq, dk = q_ref.shape
    lk = k_ref.shape[2]
    dv = v_ref.shape[3]
    g = gh * gb

    q = q_ref[...].reshape(g, lq, dk)
    k = k_ref[...].reshape(g, lk, dk)
    v = v_ref[...].reshape(g, lk, dv)

    # batched q @ k^T without an explicit in-kernel transpose
    s = jax.lax.dot_general(q, k, (((2,), (2,)), ((0,), (0,))),
                            preferred_element_type=jnp.float32)
    s = s * jnp.float32(inv_temperature)

    # masked_fill(mask, -1e12): mask block is per-batch, broadcast over heads
    masked = jnp.broadcast_to((m_ref[...] != 0)[None], (gh, gb, lq, lk))
    s = jnp.where(masked.reshape(g, lq, lk), jnp.float32(-1e12), s)

    # softmax over keys (fp32)
    s = s - jnp.max(s, axis=-1, keepdims=True)
    e = jnp.exp(s)
    p = e * pl.reciprocal(jnp.sum(e, axis=-1, keepdims=True), approx=True)
    # attention dropout: identity in eval mode
    a_ref[...] = p.reshape(gh, gb, lq, lk)

    o = jax.lax.dot_general(p.astype(v.dtype), v, (((2,), (1,)), ((0,), (0,))),
                            preferred_element_type=jnp.float32)
    o_ref[...] = o.reshape(gh, gb, lq, dv).astype(o_ref.dtype)


def _attention(qh, kh, vh, mask, temperature):
    n_head, sz_b, lq, dk = qh.shape
    lk = kh.shape[2]
    dv = vh.shape[3]

    gb = _largest_divisor_leq(sz_b, 8)
    gh = _largest_divisor_leq(n_head, max(1, 16 // gb))
    grid = (sz_b // gb, n_head // gh)      # head-group innermost: mask reused

    kern = functools.partial(_attention_kernel, inv_temperature=1.0 / temperature)
    out, attn = pl.pallas_call(
        kern,
        grid=grid,
        out_shape=(
            jax.ShapeDtypeStruct((n_head, sz_b, lq, dv), qh.dtype),
            jax.ShapeDtypeStruct((n_head, sz_b, lq, lk), jnp.float32),
        ),
        in_specs=[
            pl.BlockSpec((gh, gb, lq, dk), lambda bg, hg: (hg, bg, 0, 0)),
            pl.BlockSpec((gh, gb, lk, dk), lambda bg, hg: (hg, bg, 0, 0)),
            pl.BlockSpec((gh, gb, lk, dv), lambda bg, hg: (hg, bg, 0, 0)),
            pl.BlockSpec((gb, lq, lk), lambda bg, hg: (bg, 0, 0)),
        ],
        out_specs=(
            pl.BlockSpec((gh, gb, lq, dv), lambda bg, hg: (hg, bg, 0, 0)),
            pl.BlockSpec((gh, gb, lq, lk), lambda bg, hg: (hg, bg, 0, 0)),
        ),
        compiler_params=pltpu.CompilerParams(
            dimension_semantics=("parallel", "parallel")),
    )(qh, kh, vh, mask)
    return out, attn


# ---------------------------------------------------------------------------
# Kernel 3: fc (reduced over heads) + residual + LayerNorm, row-tiled
# ---------------------------------------------------------------------------
def _fc_ln_kernel(x_ref, w_ref, b_ref, res_ref, g_ref, beta_ref, o_ref, acc_ref):
    h = pl.program_id(1)

    @pl.when(h == 0)
    def _():
        acc_ref[...] = jnp.zeros_like(acc_ref)

    acc_ref[...] += jnp.dot(x_ref[...], w_ref[...],
                            preferred_element_type=jnp.float32)

    @pl.when(h == pl.num_programs(1) - 1)
    def _():
        # output dropout: identity in eval mode
        y = acc_ref[...] + b_ref[...] + res_ref[...]
        mu = jnp.mean(y, axis=-1, keepdims=True)
        var = jnp.mean(jnp.square(y - mu), axis=-1, keepdims=True)
        yn = (y - mu) * jax.lax.rsqrt(var + jnp.float32(1e-5))
        o_ref[...] = yn * g_ref[...] + beta_ref[...]


def _fc_residual_layernorm(x_heads, w_fc, b_fc, res2d, gamma, beta):
    n_head, m, d_v = x_heads.shape
    d_model = w_fc.shape[2]
    tm = min(m, 256)
    grid = (pl.cdiv(m, tm), n_head)        # head reduction axis last
    return pl.pallas_call(
        _fc_ln_kernel,
        grid=grid,
        out_shape=jax.ShapeDtypeStruct((m, d_model), jnp.float32),
        in_specs=[
            pl.BlockSpec((None, tm, d_v), lambda r, h: (h, r, 0)),
            pl.BlockSpec((None, d_v, d_model), lambda r, h: (h, 0, 0)),
            pl.BlockSpec((1, d_model), lambda r, h: (0, 0)),
            pl.BlockSpec((tm, d_model), lambda r, h: (r, 0)),
            pl.BlockSpec((1, d_model), lambda r, h: (0, 0)),
            pl.BlockSpec((1, d_model), lambda r, h: (0, 0)),
        ],
        out_specs=pl.BlockSpec((tm, d_model), lambda r, h: (r, 0)),
        scratch_shapes=[pltpu.VMEM((tm, d_model), jnp.float32)],
        compiler_params=pltpu.CompilerParams(
            dimension_semantics=("parallel", "arbitrary")),
    )(x_heads, w_fc, b_fc, res2d, gamma, beta)


# ---------------------------------------------------------------------------
# Parameter init (torch conventions) + one-time packing (pre-transposed bf16)
# ---------------------------------------------------------------------------
def init_params(key, n_head, d_model, d_k, d_v):
    ks = jax.random.split(key, 4)
    std_qk = jnp.sqrt(2.0 / (d_model + d_k))
    std_v = jnp.sqrt(2.0 / (d_model + d_v))
    std_fc = jnp.sqrt(2.0 / (n_head * d_v + d_model))   # xavier normal
    return {
        # torch nn.Linear stores weight as (out, in)
        "w_qs_w": jax.random.normal(ks[0], (n_head * d_k, d_model), jnp.float32) * std_qk,
        "w_qs_b": jnp.zeros((n_head * d_k,), jnp.float32),
        "w_ks_w": jax.random.normal(ks[1], (n_head * d_k, d_model), jnp.float32) * std_qk,
        "w_ks_b": jnp.zeros((n_head * d_k,), jnp.float32),
        "w_vs_w": jax.random.normal(ks[2], (n_head * d_v, d_model), jnp.float32) * std_v,
        "w_vs_b": jnp.zeros((n_head * d_v,), jnp.float32),
        "fc_w": jax.random.normal(ks[3], (d_model, n_head * d_v), jnp.float32) * std_fc,
        "fc_b": jnp.zeros((d_model,), jnp.float32),
        "ln_gamma": jnp.ones((d_model,), jnp.float32),
        "ln_beta": jnp.zeros((d_model,), jnp.float32),
    }


def pack_params(params, *, n_head, d_model, d_k, d_v, mxu_dtype=jnp.bfloat16):
    """One-time repack: per-head, pre-transposed, MXU dtype (no per-forward .T)."""
    def per_head_in_proj(w, b, d):
        w_h = w.reshape(n_head, d, d_model).transpose(0, 2, 1)   # (H, d_model, d)
        b_h = b.reshape(n_head, 1, d)
        return w_h.astype(mxu_dtype), b_h.astype(jnp.float32)

    w_q, b_q = per_head_in_proj(params["w_qs_w"], params["w_qs_b"], d_k)
    w_k, b_k = per_head_in_proj(params["w_ks_w"], params["w_ks_b"], d_k)
    w_v, b_v = per_head_in_proj(params["w_vs_w"], params["w_vs_b"], d_v)
    w_fc = params["fc_w"].T.reshape(n_head, d_v, d_model).astype(mxu_dtype)
    return {
        "w_q": w_q, "b_q": b_q,
        "w_k": w_k, "b_k": b_k,
        "w_v": w_v, "b_v": b_v,
        "w_fc": w_fc,
        "b_fc": params["fc_b"].reshape(1, d_model).astype(jnp.float32),
        "ln_g": params["ln_gamma"].reshape(1, d_model).astype(jnp.float32),
        "ln_b": params["ln_beta"].reshape(1, d_model).astype(jnp.float32),
    }


# ---------------------------------------------------------------------------
# Forward pass (only free reshapes outside the kernels; no host transposes)
# ---------------------------------------------------------------------------
def multi_head_attention(q, k, v, mask, packed, *, n_head, d_k, d_v,
                         mxu_dtype=jnp.bfloat16):
    sz_b, len_q, d_model = q.shape
    len_k = k.shape[1]
    len_v = v.shape[1]
    assert len_k == len_v

    residual = q.reshape(sz_b * len_q, d_model).astype(jnp.float32)

    qh = _project_heads(q.reshape(sz_b * len_q, d_model).astype(mxu_dtype),
                        packed["w_q"], packed["b_q"], mxu_dtype)
    kh = _project_heads(k.reshape(sz_b * len_k, d_model).astype(mxu_dtype),
                        packed["w_k"], packed["b_k"], mxu_dtype)
    vh = _project_heads(v.reshape(sz_b * len_v, d_model).astype(mxu_dtype),
                        packed["w_v"], packed["b_v"], mxu_dtype)

    qh = qh.reshape(n_head, sz_b, len_q, d_k)
    kh = kh.reshape(n_head, sz_b, len_k, d_k)
    vh = vh.reshape(n_head, sz_b, len_v, d_v)

    temperature = float(d_k) ** 0.5
    out_h, attn = _attention(qh, kh, vh, mask.astype(jnp.int32), temperature)

    out = _fc_residual_layernorm(
        out_h.reshape(n_head, sz_b * len_q, d_v),
        packed["w_fc"], packed["b_fc"], residual,
        packed["ln_g"], packed["ln_b"],
    ).reshape(sz_b, len_q, d_model)

    return out, attn.reshape(n_head * sz_b, len_q, len_k)


# ---------------------------------------------------------------------------
if __name__ == "__main__":
    n_head, d_model, d_k, d_v = 4, 32, 8, 8
    sz_b, seq = 2, 8

    key = jax.random.PRNGKey(0)
    kq, kk, kv, kp = jax.random.split(key, 4)
    q = jax.random.normal(kq, (sz_b, seq, d_model), jnp.float32)
    k = jax.random.normal(kk, (sz_b, seq, d_model), jnp.float32)
    v = jax.random.normal(kv, (sz_b, seq, d_model), jnp.float32)

    # causal mask (nonzero == masked), shape (B, Lq, Lk)
    causal = jnp.triu(jnp.ones((seq, seq), jnp.int32), k=1)
    mask = jnp.broadcast_to(causal, (sz_b, seq, seq))

    params = init_params(kp, n_head, d_model, d_k, d_v)
    packed = pack_params(params, n_head=n_head, d_model=d_model, d_k=d_k, d_v=d_v)

    fwd = jax.jit(functools.partial(
        multi_head_attention, n_head=n_head, d_k=d_k, d_v=d_v))
    out, attn = fwd(q, k, v, mask, packed)
    jax.block_until_ready((out, attn))

    assert out.shape == (sz_b, seq, d_model)
    assert attn.shape == (n_head * sz_b, seq, seq)
    assert bool(jnp.all(jnp.isfinite(out)))
    assert bool(jnp.all(jnp.isfinite(attn)))
    print("KERNEL_OK")
</pallas_src>

<mosaic_0001>
module attributes {stable_mosaic.version = 11 : i64} {
  func.func @_proj_kernel(%arg0: i32, %arg1: i32, %arg2: memref<16x32xbf16, #tpu.memory_space<vmem>>, %arg3: memref<1x32x8xbf16, #tpu.memory_space<vmem>>, %arg4: memref<1x1x8xf32, #tpu.memory_space<vmem>>, %arg5: memref<1x16x8xbf16, #tpu.memory_space<vmem>>) attributes {dimension_semantics = [#tpu.dimension_semantics<parallel>, #tpu.dimension_semantics<arbitrary>], iteration_bounds = array<i64: 1, 4>, scalar_prefetch = 0 : i64, scratch_operands = 0 : i64, tpu.core_type = #tpu.core_type<tc>, window_params = [{transform_indices = @transform_0, window_bounds = array<i64: 16, 32>}, {transform_indices = @transform_1, window_bounds = array<i64: 1, 32, 8>}, {transform_indices = @transform_2, window_bounds = array<i64: 1, 1, 8>}, {transform_indices = @transform_3, window_bounds = array<i64: 1, 16, 8>}]} {
    %c0 = arith.constant 0 : index
    %c0_0 = arith.constant 0 : index
    %0 = vector.load %arg2[%c0, %c0_0] : memref<16x32xbf16, #tpu.memory_space<vmem>>, vector<16x32xbf16>
    %c0_1 = arith.constant 0 : index
    %c0_2 = arith.constant 0 : index
    %c0_3 = arith.constant 0 : index
    %1 = vector.load %arg3[%c0_1, %c0_2, %c0_3] : memref<1x32x8xbf16, #tpu.memory_space<vmem>>, vector<1x32x8xbf16>
    %2 = vector.shape_cast %1 : vector<1x32x8xbf16> to vector<32x8xbf16>
    %cst = arith.constant dense<0.000000e+00> : vector<16x8xf32>
    %3 = tpu.matmul %0, %2, %cst {dimension_numbers = #tpu.dot_dimension_numbers<[1], [0], [0], [1], [0, 0, 1, 1], [], []>} : vector<16x32xbf16>, vector<32x8xbf16>, vector<16x8xf32> -> vector<16x8xf32>
    %c0_4 = arith.constant 0 : index
    %c0_5 = arith.constant 0 : index
    %c0_6 = arith.constant 0 : index
    %4 = vector.load %arg4[%c0_4, %c0_5, %c0_6] : memref<1x1x8xf32, #tpu.memory_space<vmem>>, vector<1x1x8xf32>
    %5 = vector.shape_cast %4 : vector<1x1x8xf32> to vector<1x8xf32>
    %6 = vector.broadcast %5 : vector<1x8xf32> to vector<16x8xf32>
    %7 = arith.addf %3, %6 : vector<16x8xf32>
    %8 = arith.truncf %7 : vector<16x8xf32> to vector<16x8xbf16>
    %c0_7 = arith.constant 0 : index
    %c0_8 = arith.constant 0 : index
    %c0_9 = arith.constant 0 : index
    %9 = vector.load %arg5[%c0_7, %c0_8, %c0_9] : memref<1x16x8xbf16, #tpu.memory_space<vmem>>, vector<1x16x8xbf16>
    %10 = vector.shape_cast %9 : vector<1x16x8xbf16> to vector<16x8xbf16>
    %11 = vector.shape_cast %8 : vector<16x8xbf16> to vector<1x16x8xbf16>
    tpu.vector_store %arg5[%c0_7, %c0_8, %c0_9], %11 {strides = array<i32>} : memref<1x16x8xbf16, #tpu.memory_space<vmem>>, vector<1x16x8xbf16>,
    return
  }
  func.func @transform_0(%arg0: i32, %arg1: i32) -> (i32, i32) {
    %c0_i32 = arith.constant 0 : i32
    %c0_i32_0 = arith.constant 0 : i32
    return %arg0, %c0_i32 : i32, i32
  }
  func.func @transform_1(%arg0: i32, %arg1: i32) -> (i32, i32, i32) {
    %c0_i32 = arith.constant 0 : i32
    %c0_i32_0 = arith.constant 0 : i32
    %c0_i32_1 = arith.constant 0 : i32
    return %arg1, %c0_i32, %c0_i32_0 : i32, i32, i32
  }
  func.func @transform_2(%arg0: i32, %arg1: i32) -> (i32, i32, i32) {
    %c0_i32 = arith.constant 0 : i32
    %c0_i32_0 = arith.constant 0 : i32
    %c0_i32_1 = arith.constant 0 : i32
    return %arg1, %c0_i32, %c0_i32_0 : i32, i32, i32
  }
  func.func @transform_3(%arg0: i32, %arg1: i32) -> (i32, i32, i32) {
    %c0_i32 = arith.constant 0 : i32
    %c0_i32_0 = arith.constant 0 : i32
    return %arg1, %arg0, %c0_i32 : i32, i32, i32
  }
}

module attributes {stable_mosaic.version = 11 : i64} {
  func.func @_attention_kernel(%arg0: i32, %arg1: i32, %arg2: memref<4x2x8x8xbf16, #tpu.memory_space<vmem>>, %arg3: memref<4x2x8x8xbf16, #tpu.memory_space<vmem>>, %arg4: memref<4x2x8x8xbf16, #tpu.memory_space<vmem>>, %arg5: memref<2x8x8xi32, #tpu.memory_space<vmem>>, %arg6: memref<4x2x8x8xbf16, #tpu.memory_space<vmem>>, %arg7: memref<4x2x8x8xf32, #tpu.memory_space<vmem>>) attributes {dimension_semantics = [#tpu.dimension_semantics<parallel>, #tpu.dimension_semantics<parallel>], iteration_bounds = array<i64: 1, 1>, scalar_prefetch = 0 : i64, scratch_operands = 0 : i64, tpu.core_type = #tpu.core_type<tc>, window_params = [{transform_indices = @transform_0, window_bounds = array<i64: 4, 2, 8, 8>}, {transform_indices = @transform_1, window_bounds = array<i64: 4, 2, 8, 8>}, {transform_indices = @transform_2, window_bounds = array<i64: 4, 2, 8, 8>}, {transform_indices = @transform_3, window_bounds = array<i64: 2, 8, 8>}, {transform_indices = @transform_4, window_bounds = array<i64: 4, 2, 8, 8>}, {transform_indices = @transform_5, window_bounds = array<i64: 4, 2, 8, 8>}]} {
    %c0 = arith.constant 0 : index
    %c0_0 = arith.constant 0 : index
    %c0_1 = arith.constant 0 : index
    %c0_2 = arith.constant 0 : index
    %0 = vector.load %arg2[%c0, %c0_0, %c0_1, %c0_2] : memref<4x2x8x8xbf16, #tpu.memory_space<vmem>>, vector<4x2x8x8xbf16>
    %1 = vector.shape_cast %0 : vector<4x2x8x8xbf16> to vector<8x8x8xbf16>
    %c0_3 = arith.constant 0 : index
    %c0_4 = arith.constant 0 : index
    %c0_5 = arith.constant 0 : index
    %c0_6 = arith.constant 0 : index
    %2 = vector.load %arg3[%c0_3, %c0_4, %c0_5, %c0_6] : memref<4x2x8x8xbf16, #tpu.memory_space<vmem>>, vector<4x2x8x8xbf16>
    %3 = vector.shape_cast %2 : vector<4x2x8x8xbf16> to vector<8x8x8xbf16>
    %c0_7 = arith.constant 0 : index
    %c0_8 = arith.constant 0 : index
    %c0_9 = arith.constant 0 : index
    %c0_10 = arith.constant 0 : index
    %4 = vector.load %arg4[%c0_7, %c0_8, %c0_9, %c0_10] : memref<4x2x8x8xbf16, #tpu.memory_space<vmem>>, vector<4x2x8x8xbf16>
    %5 = vector.shape_cast %4 : vector<4x2x8x8xbf16> to vector<8x8x8xbf16>
    %cst = arith.constant dense<0.000000e+00> : vector<8x8x8xf32>
    %6 = tpu.matmul %1, %3, %cst {dimension_numbers = #tpu.dot_dimension_numbers<[2], [2], [1], [1], [0, 0, 0, 1, 1, 1], [0], [0]>} : vector<8x8x8xbf16>, vector<8x8x8xbf16>, vector<8x8x8xf32> -> vector<8x8x8xf32>
    %cst_11 = arith.constant 0.353553385 : f32
    %7 = vector.broadcast %cst_11 : f32 to vector<8x8x8xf32>
    %8 = arith.mulf %6, %7 : vector<8x8x8xf32>
    %c0_12 = arith.constant 0 : index
    %c0_13 = arith.constant 0 : index
    %c0_14 = arith.constant 0 : index
    %9 = vector.load %arg5[%c0_12, %c0_13, %c0_14] : memref<2x8x8xi32, #tpu.memory_space<vmem>>, vector<2x8x8xi32>
    %c0_i32 = arith.constant 0 : i32
    %10 = vector.broadcast %c0_i32 : i32 to vector<2x8x8xi32>
    %11 = arith.cmpi ne, %9, %10 : vector<2x8x8xi32>
    %12 = vector.shape_cast %11 : vector<2x8x8xi1> to vector<1x2x8x8xi1>
    %13 = vector.shape_cast %12 : vector<1x2x8x8xi1> to vector<1x2x8x8xi1>
    %14 = vector.broadcast %13 : vector<1x2x8x8xi1> to vector<4x2x8x8xi1>
    %15 = vector.shape_cast %14 : vector<4x2x8x8xi1> to vector<8x8x8xi1>
    %cst_15 = arith.constant -9.99999995E+11 : f32
    %16 = vector.broadcast %cst_15 : f32 to vector<8x8x8xf32>
    %17 = arith.select %15, %16, %8 : vector<8x8x8xi1>, vector<8x8x8xf32>
    %cst_16 = arith.constant dense<0xFF800000> : vector<8x8xf32>
    %18 = vector.multi_reduction <maximumf>, %17, %cst_16 [2] : vector<8x8x8xf32> to vector<8x8xf32>
    %19 = vector.shape_cast %18 : vector<8x8xf32> to vector<8x8x1xf32>
    %20 = vector.broadcast %19 : vector<8x8x1xf32> to vector<8x8x8xf32>
    %21 = arith.subf %17, %20 : vector<8x8x8xf32>
    %22 = math.exp %21 : vector<8x8x8xf32>
    %cst_17 = arith.constant dense<0.000000e+00> : vector<8x8xf32>
    %23 = vector.multi_reduction <add>, %22, %cst_17 [2] : vector<8x8x8xf32> to vector<8x8xf32>
    %24 = vector.shape_cast %23 : vector<8x8xf32> to vector<8x8x1xf32>
    %25 = tpu.reciprocal %24 {approx = true} : vector<8x8x1xf32> -> vector<8x8x1xf32>
    %26 = vector.broadcast %25 : vector<8x8x1xf32> to vector<8x8x8xf32>
    %27 = arith.mulf %22, %26 : vector<8x8x8xf32>
    %28 = vector.shape_cast %27 : vector<8x8x8xf32> to vector<4x2x8x8xf32>
    %c0_18 = arith.constant 0 : index
    %c0_19 = arith.constant 0 : index
    %c0_20 = arith.constant 0 : index
    %c0_21 = arith.constant 0 : index
    %29 = vector.load %arg7[%c0_18, %c0_19, %c0_20, %c0_21] : memref<4x2x8x8xf32, #tpu.memory_space<vmem>>, vector<4x2x8x8xf32>
    tpu.vector_store %arg7[%c0_18, %c0_19, %c0_20, %c0_21], %28 {strides = array<i32>} : memref<4x2x8x8xf32, #tpu.memory_space<vmem>>, vector<4x2x8x8xf32>,
    %30 = arith.truncf %27 : vector<8x8x8xf32> to vector<8x8x8xbf16>
    %cst_22 = arith.constant dense<0.000000e+00> : vector<8x8x8xf32>
    %31 = tpu.matmul %30, %5, %cst_22 {dimension_numbers = #tpu.dot_dimension_numbers<[2], [1], [1], [2], [0, 0, 0, 1, 1, 2], [0], [0]>} : vector<8x8x8xbf16>, vector<8x8x8xbf16>, vector<8x8x8xf32> -> vector<8x8x8xf32>
    %32 = vector.shape_cast %31 : vector<8x8x8xf32> to vector<4x2x8x8xf32>
    %33 = arith.truncf %32 : vector<4x2x8x8xf32> to vector<4x2x8x8xbf16>
    %c0_23 = arith.constant 0 : index
    %c0_24 = arith.constant 0 : index
    %c0_25 = arith.constant 0 : index
    %c0_26 = arith.constant 0 : index
    %34 = vector.load %arg6[%c0_23, %c0_24, %c0_25, %c0_26] : memref<4x2x8x8xbf16, #tpu.memory_space<vmem>>, vector<4x2x8x8xbf16>
    tpu.vector_store %arg6[%c0_23, %c0_24, %c0_25, %c0_26], %33 {strides = array<i32>} : memref<4x2x8x8xbf16, #tpu.memory_space<vmem>>, vector<4x2x8x8xbf16>,
    return
  }
  func.func @transform_0(%arg0: i32, %arg1: i32) -> (i32, i32, i32, i32) {
    %c0_i32 = arith.constant 0 : i32
    %c0_i32_0 = arith.constant 0 : i32
    %c0_i32_1 = arith.constant 0 : i32
    return %arg1, %arg0, %c0_i32, %c0_i32_0 : i32, i32, i32, i32
  }
  func.func @transform_1(%arg0: i32, %arg1: i32) -> (i32, i32, i32, i32) {
    %c0_i32 = arith.constant 0 : i32
    %c0_i32_0 = arith.constant 0 : i32
    %c0_i32_1 = arith.constant 0 : i32
    return %arg1, %arg0, %c0_i32, %c0_i32_0 : i32, i32, i32, i32
  }
  func.func @transform_2(%arg0: i32, %arg1: i32) -> (i32, i32, i32, i32) {
    %c0_i32 = arith.constant 0 : i32
    %c0_i32_0 = arith.constant 0 : i32
    %c0_i32_1 = arith.constant 0 : i32
    return %arg1, %arg0, %c0_i32, %c0_i32_0 : i32, i32, i32, i32
  }
  func.func @transform_3(%arg0: i32, %arg1: i32) -> (i32, i32, i32) {
    %c0_i32 = arith.constant 0 : i32
    %c0_i32_0 = arith.constant 0 : i32
    %c0_i32_1 = arith.constant 0 : i32
    return %arg0, %c0_i32, %c0_i32_0 : i32, i32, i32
  }
  func.func @transform_4(%arg0: i32, %arg1: i32) -> (i32, i32, i32, i32) {
    %c0_i32 = arith.constant 0 : i32
    %c0_i32_0 = arith.constant 0 : i32
    %c0_i32_1 = arith.constant 0 : i32
    return %arg1, %arg0, %c0_i32, %c0_i32_0 : i32, i32, i32, i32
  }
  func.func @transform_5(%arg0: i32, %arg1: i32) -> (i32, i32, i32, i32) {
    %c0_i32 = arith.constant 0 : i32
    %c0_i32_0 = arith.constant 0 : i32
    %c0_i32_1 = arith.constant 0 : i32
    return %arg1, %arg0, %c0_i32, %c0_i32_0 : i32, i32, i32, i32
  }
}

module attributes {stable_mosaic.version = 11 : i64} {
  func.func @_fc_ln_kernel(%arg0: i32, %arg1: i32, %arg2: memref<1x16x8xbf16, #tpu.memory_space<vmem>>, %arg3: memref<1x8x32xbf16, #tpu.memory_space<vmem>>, %arg4: memref<1x32xf32, #tpu.memory_space<vmem>>, %arg5: memref<16x32xf32, #tpu.memory_space<vmem>>, %arg6: memref<1x32xf32, #tpu.memory_space<vmem>>, %arg7: memref<1x32xf32, #tpu.memory_space<vmem>>, %arg8: memref<16x32xf32, #tpu.memory_space<vmem>>, %arg9: memref<16x32xf32, #tpu.memory_space<vmem>>) attributes {dimension_semantics = [#tpu.dimension_semantics<parallel>, #tpu.dimension_semantics<arbitrary>], iteration_bounds = array<i64: 1, 4>, scalar_prefetch = 0 : i64, scratch_operands = 1 : i64, tpu.core_type = #tpu.core_type<tc>, window_params = [{transform_indices = @transform_0, window_bounds = array<i64: 1, 16, 8>}, {transform_indices = @transform_1, window_bounds = array<i64: 1, 8, 32>}, {pipeline_mode = #tpu.pipeline_mode<synchronous>, transform_indices = @transform_2, window_bounds = array<i64: 1, 32>}, {transform_indices = @transform_3, window_bounds = array<i64: 16, 32>}, {pipeline_mode = #tpu.pipeline_mode<synchronous>, transform_indices = @transform_4, window_bounds = array<i64: 1, 32>}, {pipeline_mode = #tpu.pipeline_mode<synchronous>, transform_indices = @transform_5, window_bounds = array<i64: 1, 32>}, {transform_indices = @transform_6, window_bounds = array<i64: 16, 32>}]} {
    %c0_i32 = arith.constant 0 : i32
    %0 = arith.cmpi eq, %arg1, %c0_i32 : i32
    %1 = arith.extui %0 : i1 to i32
    %c0_i32_0 = arith.constant 0 : i32
    %2 = arith.cmpi ne, %1, %c0_i32_0 : i32
    scf.if %2 {
      %cst_11 = arith.constant 0.000000e+00 : f32
      %14 = vector.broadcast %cst_11 : f32 to vector<16x32xf32>
      %c0_12 = arith.constant 0 : index
      %c0_13 = arith.constant 0 : index
      %15 = vector.load %arg9[%c0_12, %c0_13] : memref<16x32xf32, #tpu.memory_space<vmem>>, vector<16x32xf32>
      tpu.vector_store %arg9[%c0_12, %c0_13], %14 {strides = array<i32>} : memref<16x32xf32, #tpu.memory_space<vmem>>, vector<16x32xf32>,
    } else {
    }
    %c0 = arith.constant 0 : index
    %c0_1 = arith.constant 0 : index
    %3 = vector.load %arg9[%c0, %c0_1] : memref<16x32xf32, #tpu.memory_space<vmem>>, vector<16x32xf32>
    %c0_2 = arith.constant 0 : index
    %c0_3 = arith.constant 0 : index
    %c0_4 = arith.constant 0 : index
    %4 = vector.load %arg2[%c0_2, %c0_3, %c0_4] : memref<1x16x8xbf16, #tpu.memory_space<vmem>>, vector<1x16x8xbf16>
    %5 = vector.shape_cast %4 : vector<1x16x8xbf16> to vector<16x8xbf16>
    %c0_5 = arith.constant 0 : index
    %c0_6 = arith.constant 0 : index
    %c0_7 = arith.constant 0 : index
    %6 = vector.load %arg3[%c0_5, %c0_6, %c0_7] : memref<1x8x32xbf16, #tpu.memory_space<vmem>>, vector<1x8x32xbf16>
    %7 = vector.shape_cast %6 : vector<1x8x32xbf16> to vector<8x32xbf16>
    %cst = arith.constant dense<0.000000e+00> : vector<16x32xf32>
    %8 = tpu.matmul %5, %7, %cst {dimension_numbers = #tpu.dot_dimension_numbers<[1], [0], [0], [1], [0, 0, 1, 1], [], []>} : vector<16x8xbf16>, vector<8x32xbf16>, vector<16x32xf32> -> vector<16x32xf32>
    %9 = arith.addf %3, %8 : vector<16x32xf32>
    %c0_8 = arith.constant 0 : index
    %c0_9 = arith.constant 0 : index
    %10 = vector.load %arg9[%c0_8, %c0_9] : memref<16x32xf32, #tpu.memory_space<vmem>>, vector<16x32xf32>
    tpu.vector_store %arg9[%c0_8, %c0_9], %9 {strides = array<i32>} : memref<16x32xf32, #tpu.memory_space<vmem>>, vector<16x32xf32>,
    %c3_i32 = arith.constant 3 : i32
    %11 = arith.cmpi eq, %arg1, %c3_i32 : i32
    %12 = arith.extui %11 : i1 to i32
    %c0_i32_10 = arith.constant 0 : i32
    %13 = arith.cmpi ne, %12, %c0_i32_10 : i32
    scf.if %13 {
      %c0_11 = arith.constant 0 : index
      %c0_12 = arith.constant 0 : index
      %14 = vector.load %arg9[%c0_11, %c0_12] : memref<16x32xf32, #tpu.memory_space<vmem>>, vector<16x32xf32>
      %c0_13 = arith.constant 0 : index
      %c0_14 = arith.constant 0 : index
      %15 = vector.load %arg4[%c0_13, %c0_14] : memref<1x32xf32, #tpu.memory_space<vmem>>, vector<1x32xf32>
      %16 = vector.broadcast %15 : vector<1x32xf32> to vector<16x32xf32>
      %17 = arith.addf %14, %16 : vector<16x32xf32>
      %c0_15 = arith.constant 0 : index
      %c0_16 = arith.constant 0 : index
      %18 = vector.load %arg5[%c0_15, %c0_16] : memref<16x32xf32, #tpu.memory_space<vmem>>, vector<16x32xf32>
      %19 = arith.addf %17, %18 : vector<16x32xf32>
      %cst_17 = arith.constant dense<0.000000e+00> : vector<16xf32>
      %20 = vector.multi_reduction <add>, %19, %cst_17 [1] : vector<16x32xf32> to vector<16xf32>
      %21 = vector.shape_cast %20 : vector<16xf32> to vector<16x1xf32>
      %cst_18 = arith.constant 3.200000e+01 : f32
      %22 = vector.broadcast %cst_18 : f32 to vector<16x1xf32>
      %23 = arith.divf %21, %22 : vector<16x1xf32>
      %24 = vector.broadcast %23 : vector<16x1xf32> to vector<16x32xf32>
      %25 = arith.subf %19, %24 : vector<16x32xf32>
      %26 = arith.mulf %25, %25 : vector<16x32xf32>
      %cst_19 = arith.constant dense<0.000000e+00> : vector<16xf32>
      %27 = vector.multi_reduction <add>, %26, %cst_19 [1] : vector<16x32xf32> to vector<16xf32>
      %28 = vector.shape_cast %27 : vector<16xf32> to vector<16x1xf32>
      %cst_20 = arith.constant 3.200000e+01 : f32
      %29 = vector.broadcast %cst_20 : f32 to vector<16x1xf32>
      %30 = arith.divf %28, %29 : vector<16x1xf32>
      %31 = vector.broadcast %23 : vector<16x1xf32> to vector<16x32xf32>
      %32 = arith.subf %19, %31 : vector<16x32xf32>
      %cst_21 = arith.constant 9.99999974E-6 : f32
      %33 = vector.broadcast %cst_21 : f32 to vector<16x1xf32>
      %34 = arith.addf %30, %33 : vector<16x1xf32>
      %35 = math.rsqrt %34 : vector<16x1xf32>
      %36 = vector.broadcast %35 : vector<16x1xf32> to vector<16x32xf32>
      %37 = arith.mulf %32, %36 : vector<16x32xf32>
      %c0_22 = arith.constant 0 : index
      %c0_23 = arith.constant 0 : index
      %38 = vector.load %arg6[%c0_22, %c0_23] : memref<1x32xf32, #tpu.memory_space<vmem>>, vector<1x32xf32>
      %39 = vector.broadcast %38 : vector<1x32xf32> to vector<16x32xf32>
      %40 = arith.mulf %37, %39 : vector<16x32xf32>
      %c0_24 = arith.constant 0 : index
      %c0_25 = arith.constant 0 : index
      %41 = vector.load %arg7[%c0_24, %c0_25] : memref<1x32xf32, #tpu.memory_space<vmem>>, vector<1x32xf32>
      %42 = vector.broadcast %41 : vector<1x32xf32> to vector<16x32xf32>
      %43 = arith.addf %40, %42 : vector<16x32xf32>
      %c0_26 = arith.constant 0 : index
      %c0_27 = arith.constant 0 : index
      %44 = vector.load %arg8[%c0_26, %c0_27] : memref<16x32xf32, #tpu.memory_space<vmem>>, vector<16x32xf32>
      tpu.vector_store %arg8[%c0_26, %c0_27], %43 {strides = array<i32>} : memref<16x32xf32, #tpu.memory_space<vmem>>, vector<16x32xf32>,
    } else {
    }
    return
  }
  func.func @transform_0(%arg0: i32, %arg1: i32) -> (i32, i32, i32) {
    %c0_i32 = arith.constant 0 : i32
    %c0_i32_0 = arith.constant 0 : i32
    return %arg1, %arg0, %c0_i32 : i32, i32, i32
  }
  func.func @transform_1(%arg0: i32, %arg1: i32) -> (i32, i32, i32) {
    %c0_i32 = arith.constant 0 : i32
    %c0_i32_0 = arith.constant 0 : i32
    %c0_i32_1 = arith.constant 0 : i32
    return %arg1, %c0_i32, %c0_i32_0 : i32, i32, i32
  }
  func.func @transform_2(%arg0: i32, %arg1: i32) -> (i32, i32) {
    %c0_i32 = arith.constant 0 : i32
    %c0_i32_0 = arith.constant 0 : i32
    %c0_i32_1 = arith.constant 0 : i32
    return %c0_i32, %c0_i32_0 : i32, i32
  }
  func.func @transform_3(%arg0: i32, %arg1: i32) -> (i32, i32) {
    %c0_i32 = arith.constant 0 : i32
    %c0_i32_0 = arith.constant 0 : i32
    return %arg0, %c0_i32 : i32, i32
  }
  func.func @transform_4(%arg0: i32, %arg1: i32) -> (i32, i32) {
    %c0_i32 = arith.constant 0 : i32
    %c0_i32_0 = arith.constant 0 : i32
    %c0_i32_1 = arith.constant 0 : i32
    return %c0_i32, %c0_i32_0 : i32, i32
  }
  func.func @transform_5(%arg0: i32, %arg1: i32) -> (i32, i32) {
    %c0_i32 = arith.constant 0 : i32
    %c0_i32_0 = arith.constant 0 : i32
    %c0_i32_1 = arith.constant 0 : i32
    return %c0_i32, %c0_i32_0 : i32, i32
  }
  func.func @transform_6(%arg0: i32, %arg1: i32) -> (i32, i32) {
    %c0_i32 = arith.constant 0 : i32
    %c0_i32_0 = arith.constant 0 : i32
    return %arg0, %c0_i32 : i32, i32
  }
}

</mosaic_0001>

<bundles_post_ra>
// kernel: multi_head_attention.9
= control target key start
LH: loop header
LB: loop body
LE: loop exit
PB: predicated region body
PF: predicated region fallthrough
CT: control target
= control target key end

     0   :  { %11 = vsyncpa [#allocation4], 0  ;;  %s708_s21 = smov 0   ;;  %s710_s22 = smov 0   ;;  %s799_s0 = inlined_call_operand.vmem [shape: bf16[4,16,8], index: 0, kind: input, shape index: {}]   ;;  %s800_s1 = inlined_call_operand.vmem [shape: bf16[4,8,32], index: 1, kind: input, shape index: {}]   ;;  %s801_s2 = inlined_call_operand.vmem [shape: f32[1,32], index: 2, kind: input, shape index: {}]   ;;  %s802_s3 = inlined_call_operand.vmem [shape: f32[16,32], index: 3, kind: input, shape index: {}]   ;;  %s803_s4 = inlined_call_operand.vmem [shape: f32[1,32], index: 4, kind: input, shape index: {}]   ;;  %s804_s5 = inlined_call_operand.vmem [shape: f32[1,32], index: 5, kind: input, shape index: {}]   ;;  %s805_s6 = inlined_call_operand.hbm [shape: f32[16,32], index: 6, kind: output, shape index: {}]  }
   0x1   :  { %s712_s23 = smov 0  }
   0x2 LB: > { %s544_s24 = sadd.s32 4294967295, %s665_s23   ;;  %s26_s25 = sadd.s32 1, %s661_s22  ;;  %s665_s23 = sphi %s712_s23, %s17_s23   ;;  %s661_s22 = sphi %s710_s22, %s808_s22   ;;  %s657_s21 = sphi %s708_s21, %s807_s21  }
   0x3   : > { %p27_p0 = scmp.ge.s32.totalorder %s26_s25, 4  ;;  %p548_p1 = scmp.ge.s32.totalorder %s665_s23, 1 }
   0x4   : > { %p252_p2 = scmp.lt.s32.totalorder %s665_s23, 5 }
   0x5   : > { %s810_s25 = smov (%p27_p0, %s26_s25), 0 }
   0x6   : > { %p253_p3 = pnand %p548_p1, %p252_p2 }
   0x7   : > { %p291_p4 = scmp.lt.s32.totalorder (!%p253_p3), %s657_s21, 3  ;;  %p552_p5 = scmp.ne.s32.totalorder (!%p253_p3), %s657_s21, 0 }
   0x8   : > { %256 = sbr.rel (%p253_p3) target bundleno = 598 (0x256), region = 44 }
   0xf   : > { %s292_s26 = scalar_select %p291_p4, %s657_s21, 3 }
  0x10   : > { %315 = sbr.rel (%p552_p5) target bundleno = 23 (0x17), region = 48  ;;  %vm316_vm0 = vcmask (!%p552_p5), 261120   ;;  %v667_v0 = vmov (!%p552_p5), 0.0  }
  0x11   : > { %s563_s27 = sshll.u32 %s292_s26, 3  ;;  %s551_s28 = sshll.u32 %s292_s26, 2  ;;  %317 = vst.msk [vmem:[#allocation2] sm:$0xff] (!%p552_p5), %vm316_vm0, %v667_v0  ;;  %318 = vst.msk [vmem:[#allocation2 + $0x8] sm:$0xff] (!%p552_p5), %vm316_vm0, %v667_v0 }
  0x12   : > { %s298_s7 = scalar_lea.vmem %s799_s0, %s563_s27  ;;  %s303_s10 = scalar_lea.vmem %s800_s1, %s551_s28 }
  0x17 PF: > { %v323_v1 = vld [vmem:[%s303_s10] sm:$0xf]  ;;  %vm333_vm1 = vcmask 1043456   ;;  %v668_v2 = vmov 0.0   ;;  %vm669_vm2 = vmmov 0   ;;  %vm329_vm3 = vcmask 64512  }
  0x18   : > { %566 = vmatprep.subr.bf16.mxu0 %v668_v2  ;;  %v335_v3 = vsel %vm333_vm1, %v323_v1, 0  ;;  %568 = vmatprep.mubr.msk.bf16.mxu0 %vm669_vm2, %v668_v2  ;;  %v608_v4 = vld [vmem:[%s298_s7] sm:$0xff]   ;;  %vm380_vm4 = vcmask 261120   ;;  %v320_v7 = vld [vmem:[#allocation2 + $0x8] sm:$0xff]  ;;  %p555_p6 = scmp.ne.s32.totalorder %s657_s21, 3 }
  0x19   : > { %567 = vmatpush3.bf16.msra.mxu0 %v335_v3  ;;  %v319_v5 = vld [vmem:[#allocation2] sm:$0xff]  ;;  %v399_v18 = vld [vmem:[%s802_s3 + $0x8] sm:$0xff] (!%p555_p6) }
  0x1a   : > { %v556_v14 = vld [vmem:[%s801_s2] ss:$0 sm:$0xff] (!%p555_p6) }
  0x1b   : > { %v398_v15 = vld [vmem:[%s802_s3] sm:$0xff] (!%p555_p6) }
  0x1c   : > { %569 = vmatmul.mubr.msk.bf16.vlgmr.msra.gmra.mrb[0].mxu0 %vm329_vm3, %v608_v4  ;;  %v557_v41 = vld [vmem:[%s803_s4] ss:$0 sm:$0xff] (!%p555_p6) }
  0x1d   : > { %v558_v43 = vld [vmem:[%s804_s5] ss:$0 sm:$0xff] (!%p555_p6) }
  0xee   : > { %386 = sbr.rel (%p555_p6) target bundleno = 572 (0x23c), region = 52 }
  0xef   : > { %v371_v6 = vpop.f32.mrb[0].mxu0 }
  0xf0   : > { %v378_v8 = vadd.f32 %v371_v6, %v319_v5  ;;  %v570_v9 = vpop.f32.mrb[1].mxu0 }
  0xf1   : > { %v374_v10 = vpop.f32.mrb[2].mxu0 }
  0xf2   : > { %381 = vst.msk [vmem:[#allocation2] sm:$0xff] %vm380_vm4, %v378_v8  ;;  %v379_v11 = vadd.f32 %v374_v10, %v320_v7  ;;  %v571_v12 = vpop.f32.mrb[3].mxu0 }
  0xf4   : > { %382 = vst.msk [vmem:[#allocation2 + $0x8] sm:$0xff] %vm380_vm4, %v379_v11 }
  0xf9   : > { %v387_v13 = vld [vmem:[#allocation2] sm:$0xff] }
  0xfa   : > { %v396_v16 = vadd.f32 %v556_v14, %v387_v13 }
  0xfb   : > { %v388_v17 = vld [vmem:[#allocation2 + $0x8] sm:$0xff] }
  0xfc   : > { %v397_v19 = vadd.f32 %v556_v14, %v388_v17  ;;  %v400_v20 = vadd.f32 %v398_v15, %v396_v16 }
  0xfe   : > { %v401_v21 = vadd.f32 %v399_v18, %v397_v19  ;;  %v402_v22 = vsel %vm380_vm4, %v400_v20, 0.0 }
  0xff   : > { %403 = vadd.xlane.f32.xlu0 %v402_v22 }
 0x100   : > { %v405_v23 = vsel %vm380_vm4, %v401_v21, 0.0 }
 0x103   : > { %406 = vadd.xlane.f32.xlu0 %v405_v23 }
 0x18c   : > { %v404_v24 = vpop.xlane.xlu0 %403 }
 0x18d   : > { %v409_v25 = vmul.f32 0.03125, %v404_v24 }
 0x18f   : > { %v411_v26 = vsub.f32 %v400_v20, %v409_v25 }
 0x190   : > { %v407_v27 = vpop.xlane.xlu0 %406 }
 0x191   : > { %v410_v28 = vmul.f32 0.03125, %v407_v27  ;;  %v413_v29 = vmul.f32 %v411_v26, %v411_v26 }
 0x193   : > { %v412_v30 = vsub.f32 %v401_v21, %v410_v28  ;;  %v415_v31 = vsel %vm380_vm4, %v413_v29, 0.0 }
 0x194   : > { %416 = vadd.xlane.f32.xlu1 %v415_v31 }
 0x195   : > { %v414_v32 = vmul.f32 %v412_v30, %v412_v30 }
 0x197   : > { %v418_v33 = vsel %vm380_vm4, %v414_v32, 0.0 }
 0x198   : > { %419 = vadd.xlane.f32.xlu1 %v418_v33 }
 0x221   : > { %v417_v34 = vpop.xlane.xlu1 %416 }
 0x222   : > { %v421_v35 = vmul.f32 0.03125, %v417_v34 }
 0x224   : > { %v423_v36 = vadd.f32 1e-05, %v421_v35 }
 0x225   : > { %v420_v37 = vpop.xlane.xlu1 %419 }
 0x226   : > { %609 = vrsqrt.f32 %v423_v36  ;;  %v422_v38 = vmul.f32 0.03125, %v420_v37 }
 0x228   : > { %v424_v39 = vadd.f32 1e-05, %v422_v38 }
 0x22a   : > { %611 = vrsqrt.f32 %v424_v39 }
 0x230   : > { %v610_v40 = vpop.eup %609 }
 0x231   : > { %v427_v42 = vmul.f32 %v610_v40, %v411_v26 }
 0x233   : > { %v436_v44 = vmul.f32 %v557_v41, %v427_v42 }
 0x234   : > { %v612_v45 = vpop.eup %611 }
 0x235   : > { %v445_v46 = vadd.f32 %v558_v43, %v436_v44  ;;  %v428_v47 = vmul.f32 %v612_v45, %v412_v30 }
 0x237   : > { %447 = vst.msk [vmem:[#allocation3] sm:$0xff] %vm380_vm4, %v445_v46  ;;  %v437_v48 = vmul.f32 %v557_v41, %v428_v47 }
 0x239   : > { %v446_v49 = vadd.f32 %v558_v43, %v437_v48 }
 0x23b   : > { %448 = vst.msk [vmem:[#allocation3 + $0x8] sm:$0xff] %vm380_vm4, %v446_v49 }
 0x23c PF: > { %p764_p7 = scmp.eq.s32.totalorder %s544_s24, 3  ;;  %s670_s26 = smov [#allocation3]  }
 0x23d   : > { %s458_s27 = sshll.u32 %s670_s26, 4  ;;  %s459_s27 = int_to_ptr.vmem [resolvable:$true] %s458_s27 }
 0x23e   : > { %s613_s28 = scalar_lea.vmem %s459_s27, 256  ;;  %p620_p11 = scmp.lt.s32.totalorder %s459_s27, %s459_s27 }
 0x23f   : > { %p614_p8 = scmp.ne.s32.totalorder %s459_s27, %s613_s28  ;;  %p621_p12 = scmp.lt.s32.totalorder %s613_s28, %s613_s28 }
 0x241   : > { %p615_p9 = pnand %p614_p8, %p764_p7  ;;  %p622_p13 = por %p621_p12, %p620_p11 }
 0x243   : > { %p616_p10 = pneg %p615_p9 }
 0x245   : > { %p623_p0 = pnand %p622_p13, %p616_p10 }
 0x247   : > { %626 = shalt.err (!%p623_p0)
}
 0x248   : > { %s627_s24 = scalar_lea.hbm %s805_s6, 256 }
 0x249   : > { %p628_p1 = scmp.ne.s32.totalorder %s805_s6, %s627_s24  ;;  %p633_p4 = scmp.lt.u32.totalorder %s627_s24, %s805_s6 }
 0x24b   : > { %p629_p2 = pnand %p628_p1, %p764_p7 }
 0x24d   : > { %p630_p3 = pneg %p629_p2 }
 0x24f   : > { %p635_p5 = pnand %p633_p4, %p630_p3 }
 0x251   : > { %638 = shalt.err (!%p635_p5)
}
 0x252   : > { %s671_s11 = smov 128   ;;  %s672_s12 = smov 8  }
 0x253   : > { %573 = dma.vmem_to_hbm [thread:$0]  (%p764_p7), %s459_s27, 256, %s805_s6, [#allocation4], %s671_s11, %s671_s11, %s672_s12  }
 0x254   : > { %652 = dma.done.wait (%p764_p7), [#allocation4], 256  }
 0x255   : > { %654 = vsyncadd (%p764_p7), [#allocation4], 4294967040 }
 0x256 PF: > { %s17_s23 = sadd.s32 1, %s665_s23   ;;  %s807_s21 = smov %s661_s22 }
 0x257   : > { %p14_p6 = scmp.ge.s32.totalorder %s17_s23, 6   ;;  %s808_s22 = smov %s810_s25 }
 0x259   :  { %16 = sbr.rel (!%p14_p6) target bundleno = 2 (0x2), region = 86 }
 0x260   :  { %474 = vsyncpa [#allocation4], 1 }
 0x261   :  { %476 = vsyncpa [#allocation4 + $0x1], 1 }

// kernel: multi_head_attention.6
= control target key start
LH: loop header
LB: loop body
LE: loop exit
PB: predicated region body
PF: predicated region fallthrough
CT: control target
= control target key end

     0   :  { %s531_s12 = smov 0   ;;  %s533_s13 = smov 0   ;;  %s570_s0 = inlined_call_operand.vmem [shape: bf16[16,32], index: 0, kind: input, shape index: {}]   ;;  %s571_s1 = inlined_call_operand.vmem [shape: bf16[4,32,8], index: 1, kind: input, shape index: {}]   ;;  %s572_s2 = inlined_call_operand.vmem [shape: f32[4,1,8], index: 2, kind: input, shape index: {}]   ;;  %s573_s3 = inlined_call_operand.vmem [shape: bf16[4,16,8], index: 3, kind: output, shape index: {}]  }
   0x1   :  { %s535_s14 = smov 0  }
   0x2 LB: > { %s22_s15 = sadd.s32 1, %s503_s13  ;;  %p427_p0 = scmp.ge.s32.totalorder %s507_s14, 1  ;;  %s507_s14 = sphi %s535_s14, %s13_s14   ;;  %s503_s13 = sphi %s533_s13, %s575_s13   ;;  %s499_s12 = sphi %s531_s12, %s574_s12  }
   0x3   : > { %p23_p1 = scmp.ge.s32.totalorder %s22_s15, 4  ;;  %p170_p2 = scmp.lt.s32.totalorder %s507_s14, 5 }
   0x5   : > { %s577_s15 = smov (%p23_p1, %s22_s15), 0  ;;  %p171_p3 = pnand %p427_p0, %p170_p2 }
   0x6   : > { %p212_p4 = scmp.lt.s32.totalorder (!%p171_p3), %s499_s12, 3  ;;  %v509_v0 = vmov (!%p171_p3), 0.0   ;;  %vm510_vm0 = vmmov (!%p171_p3), 0   ;;  %v484_v3 = vld [vmem:[%s570_s0] sm:$0xff] (!%p171_p3)   ;;  %vm261_vm1 = vcmask (!%p171_p3), 261120   ;;  %vm314_vm2 = vcmask (!%p171_p3), 60416  }
   0x7   : > { %174 = sbr.rel (%p171_p3) target bundleno = 244 (0xf4), region = 32  ;;  %448 = vmatprep.subr.bf16.mxu0 (!%p171_p3), %v509_v0  ;;  %452 = vmatprep.mubr.msk.bf16.mxu0 (!%p171_p3), %vm510_vm0, %v509_v0 }
   0xe   : > { %s579_s12 = smov (!%p212_p4, %s499_s12), 3 }
   0xf   : > { %s441_s16 = sshll.u32 %s579_s12, 4  ;;  %s219_s24 = scalar_lea.vmem %s572_s2, %s579_s12 }
  0x10   : > { %s216_s19 = scalar_lea.vmem %s571_s1, %s441_s16  ;;  %v432_v4 = vld [vmem:[%s219_s24] ss:$0 sm:$0xff]  ;;  %s442_s25 = sshll.u32 %s579_s12, 3 }
  0x11   : > { %v482_v1 = vld [vmem:[%s216_s19] sm:$0xff]   ;;  %v483_v2 = vld [vmem:[%s216_s19 + $0x8] sm:$0xff]   ;;  %s228_s28 = scalar_lea.vmem %s573_s3, %s442_s25 }
  0x12   : > { %449 = vmatpush3.bf16.msra.mxu0 %v482_v1 }
  0x13   : > { %450 = vmatprep.subr.bf16.mxu0 %v509_v0 }
  0x16   : > { %451 = vmatpush3.bf16.msra.mxu0 %v483_v2 }
  0x19   : > { %453 = vmatmul.mubr.msk.bf16.vlgmr.msra.gmra.mrb[0].mxu0 %vm261_vm1, %v484_v3 }
  0xec   : > { %v299_v5 = vpop.f32.mrb[0].mxu0 }
  0xed   : > { %v300_v6 = vadd.f32 %v432_v4, %v299_v5  ;;  %v454_v7 = vpop.f32.mrb[1].mxu0 }
  0xee   : > { %v302_v8 = vpop.f32.mrb[2].mxu0 }
  0xef   : > { %v443_v9 = vpack.c.bf16 %v300_v6, %v300_v6  ;;  %v303_v10 = vadd.f32 %v432_v4, %v302_v8  ;;  %v455_v11 = vpop.f32.mrb[3].mxu0 }
  0xf1   : > { %315 = vst.msk [vmem:[%s228_s28] sm:$0xf] %vm314_vm2, %v443_v9  ;;  %v444_v12 = vpack.c.bf16 %v303_v10, %v303_v10 }
  0xf3   : > { %316 = vst.msk [vmem:[%s228_s28 + $0x4] sm:$0xf] %vm314_vm2, %v444_v12 }
  0xf4 PF: > { %s13_s14 = sadd.s32 1, %s507_s14   ;;  %s574_s12 = smov %s503_s13 }
  0xf5   : > { %p10_p5 = scmp.ge.s32.totalorder %s13_s14, 6   ;;  %s575_s13 = smov %s577_s15 }
  0xf7   :  { %12 = sbr.rel (!%p10_p5) target bundleno = 2 (0x2), region = 68 }

// kernel: multi_head_attention.8
= control target key start
LH: loop header
LB: loop body
LE: loop exit
PB: predicated region body
PF: predicated region fallthrough
CT: control target
= control target key end

     0   :  { %vm45_vm0 = vcmask 64512   ;;  %v1153_v2 = vmov 0.0   ;;  %vm1154_vm1 = vmmov 0   ;;  %s1453_s0 = inlined_call_operand.vmem [shape: bf16[4,2,8,8], index: 0, kind: input, shape index: {}]   ;;  %s1454_s1 = inlined_call_operand.vmem [shape: bf16[4,2,8,8], index: 1, kind: input, shape index: {}]   ;;  %s1455_s2 = inlined_call_operand.vmem [shape: bf16[4,2,8,8], index: 2, kind: input, shape index: {}]   ;;  %s1456_s3 = inlined_call_operand.vmem [shape: s32[2,8,8], index: 3, kind: input, shape index: {}]   ;;  %s1457_s4 = inlined_call_operand.vmem [shape: bf16[4,2,8,8], index: 4, kind: output, shape index: {0}]   ;;  %s1458_s5 = inlined_call_operand.hbm [shape: f32[4,2,8,8], index: 5, kind: output, shape index: {1}]  }
   0x1   :  { %v29_v0 = vld [vmem:[%s1454_s1] sm:$0xf]  ;;  %v30_v1 = vld [vmem:[%s1454_s1 + $0x4] sm:$0xf]  ;;  %996 = vmatprep.subr.bf16.mxu0 %v1153_v2  ;;  %1002 = vmatprep.subr.bf16.mxu1 %v1153_v2  ;;  %v31_v5 = vld [vmem:[%s1454_s1 + $0x8] sm:$0xf] }
   0x2   :  { %v50_v3 = vsel %vm45_vm0, %v29_v0, 0  ;;  %v96_v4 = vsel %vm45_vm0, %v30_v1, 0  ;;  %998 = vmatprep.mubr.msk.bf16.mxu0 %vm1154_vm1, %v1153_v2  ;;  %1004 = vmatprep.mubr.msk.bf16.mxu1 %vm1154_vm1, %v1153_v2  ;;  %v32_v6 = vld [vmem:[%s1454_s1 + $0xc] sm:$0xf]  ;;  %v21_v7 = vld [vmem:[%s1453_s0] sm:$0xf] }
   0x3   :  { %997 = vmatpush3.bf16.xpose.msra.mxu0 %v50_v3  ;;  %1003 = vmatpush3.bf16.xpose.msra.mxu1 %v96_v4  ;;  %v22_v8 = vld [vmem:[%s1453_s0 + $0x4] sm:$0xf]  ;;  %v142_v9 = vsel %vm45_vm0, %v31_v5, 0  ;;  %v188_v10 = vsel %vm45_vm0, %v32_v6, 0 }
   0x4   :  { %1008 = vmatprep.subr.bf16.mxu0 %v1153_v2  ;;  %1014 = vmatprep.subr.bf16.mxu1 %v1153_v2 }
   0x5   :  { %11 = vsyncpa [#allocation3], 0  ;;  %v33_v11 = vld [vmem:[%s1454_s1 + $0x10] sm:$0xf]  ;;  %v34_v12 = vld [vmem:[%s1454_s1 + $0x14] sm:$0xf] }
   0x6   :  { %v23_v13 = vld [vmem:[%s1453_s0 + $0x8] sm:$0xf]  ;;  %v24_v14 = vld [vmem:[%s1453_s0 + $0xc] sm:$0xf]  ;;  %v234_v15 = vsel %vm45_vm0, %v33_v11, 0  ;;  %v280_v16 = vsel %vm45_vm0, %v34_v12, 0 }
   0x7   :  { %v35_v17 = vld [vmem:[%s1454_s1 + $0x18] sm:$0xf]  ;;  %v36_v18 = vld [vmem:[%s1454_s1 + $0x1c] sm:$0xf]  ;;  %v25_v19 = vld [vmem:[%s1453_s0 + $0x10] sm:$0xf] }
   0x8   :  { %v26_v20 = vld [vmem:[%s1453_s0 + $0x14] sm:$0xf]  ;;  %v326_v21 = vsel %vm45_vm0, %v35_v17, 0  ;;  %v372_v22 = vsel %vm45_vm0, %v36_v18, 0  ;;  %v27_v23 = vld [vmem:[%s1453_s0 + $0x18] sm:$0xf] }
   0x9   :  { %v28_v24 = vld [vmem:[%s1453_s0 + $0x1c] sm:$0xf]  ;;  %v1285_v25 = vld [vmem:[%s1456_s3] sm:$0xff]  ;;  %v423_v26 = vld [vmem:[%s1456_s3 + $0x8] sm:$0xff]  ;;  %vm545_vm4 = vcmask 1043456  }
   0xa   :  { %999 = vmatmul.mubr.msk.bf16.vlgmr.msra.gmra.mrb[0].mxu0 %vm45_vm0, %v21_v7  ;;  %1005 = vmatmul.mubr.msk.bf16.vlgmr.msra.gmra.mrb[0].mxu1 %vm45_vm0, %v22_v8  ;;  %vm424_vm2 = vcmp.ne.s32.totalorder %v1285_v25, 0  ;;  %vm425_vm3 = vcmp.ne.s32.totalorder %v423_v26, 0 }
   0xb   :  { %1009 = vmatpush3.bf16.xpose.msra.mxu0 %v142_v9  ;;  %1015 = vmatpush3.bf16.xpose.msra.mxu1 %v188_v10 }
   0xc   :  { %1010 = vmatprep.mubr.msk.bf16.mxu0 %vm1154_vm1, %v1153_v2  ;;  %1016 = vmatprep.mubr.msk.bf16.mxu1 %vm1154_vm1, %v1153_v2 }
   0xd   :  { %1020 = vmatprep.subr.bf16.mxu0 %v1153_v2  ;;  %1026 = vmatprep.subr.bf16.mxu1 %v1153_v2 }
  0x12   :  { %1011 = vmatmul.mubr.msk.bf16.vlgmr.msra.gmra.mrb[4].mxu0 %vm45_vm0, %v23_v13  ;;  %1017 = vmatmul.mubr.msk.bf16.vlgmr.msra.gmra.mrb[4].mxu1 %vm45_vm0, %v24_v14 }
  0x13   :  { %1021 = vmatpush3.bf16.xpose.msra.mxu0 %v234_v15  ;;  %1027 = vmatpush3.bf16.xpose.msra.mxu1 %v280_v16 }
  0x14   :  { %1022 = vmatprep.mubr.msk.bf16.mxu0 %vm1154_vm1, %v1153_v2  ;;  %1028 = vmatprep.mubr.msk.bf16.mxu1 %vm1154_vm1, %v1153_v2 }
  0x15   :  { %1032 = vmatprep.subr.bf16.mxu0 %v1153_v2  ;;  %1038 = vmatprep.subr.bf16.mxu1 %v1153_v2 }
  0x1a   :  { %1023 = vmatmul.mubr.msk.bf16.vlgmr.msra.gmra.mrb[8].mxu0 %vm45_vm0, %v25_v19  ;;  %1029 = vmatmul.mubr.msk.bf16.vlgmr.msra.gmra.mrb[8].mxu1 %vm45_vm0, %v26_v20 }
  0x1b   :  { %1033 = vmatpush3.bf16.xpose.msra.mxu0 %v326_v21  ;;  %1039 = vmatpush3.bf16.xpose.msra.mxu1 %v372_v22 }
  0x1c   :  { %1034 = vmatprep.mubr.msk.bf16.mxu0 %vm1154_vm1, %v1153_v2  ;;  %1040 = vmatprep.mubr.msk.bf16.mxu1 %vm1154_vm1, %v1153_v2 }
  0x1d   :  { %1044 = vmatprep.subr.bf16.mxu0 %v1153_v2  ;;  %1050 = vmatprep.subr.bf16.mxu1 %v1153_v2 }
  0x22   :  { %1035 = vmatmul.mubr.msk.bf16.vlgmr.msra.gmra.mrb[12].mxu0 %vm45_vm0, %v27_v23  ;;  %1041 = vmatmul.mubr.msk.bf16.vlgmr.msra.gmra.mrb[12].mxu1 %vm45_vm0, %v28_v24 }
  0x23   :  { %1046 = vmatprep.mubr.msk.bf16.mxu0 %vm1154_vm1, %v1153_v2  ;;  %1052 = vmatprep.mubr.msk.bf16.mxu1 %vm1154_vm1, %v1153_v2 }
  0xdd   :  { %v86_v27 = vpop.f32.mrb[0].mxu0  ;;  %v132_v28 = vpop.f32.mrb[0].mxu1 }
  0xde   :  { %v414_v29 = vmul.f32 0.35355338, %v86_v27  ;;  %v1000_v30 = vpop.f32.mrb[1].mxu0  ;;  %v415_v31 = vmul.f32 0.35355338, %v132_v28  ;;  %v1006_v32 = vpop.f32.mrb[1].mxu1 }
  0xdf   :  { %v89_v33 = vpop.f32.mrb[2].mxu0  ;;  %v135_v34 = vpop.f32.mrb[2].mxu1 }
  0xe0   :  { %v1001_v35 = vpop.f32.mrb[3].mxu0  ;;  %v1007_v36 = vpop.f32.mrb[3].mxu1  ;;  %v430_v37 = vsel %vm424_vm2, -1e+12, %v414_v29  ;;  %v431_v38 = vsel %vm425_vm3, -1e+12, %v415_v31 }
  0xe1   :  { %v438_v39 = vsel %vm45_vm0, %v430_v37, -inf  ;;  %v441_v40 = vsel %vm45_vm0, %v431_v38, -inf }
  0xe2   :  { %439 = vmax.xlane.f32.xlu0 %v438_v39 }
  0xe5   :  { %v178_v41 = vpop.f32.mrb[4].mxu0  ;;  %v224_v42 = vpop.f32.mrb[4].mxu1 }
  0xe6   :  { %v416_v43 = vmul.f32 0.35355338, %v178_v41  ;;  %442 = vmax.xlane.f32.xlu0 %v441_v40  ;;  %v1012_v44 = vpop.f32.mrb[5].mxu0  ;;  %v417_v45 = vmul.f32 0.35355338, %v224_v42  ;;  %v1018_v46 = vpop.f32.mrb[5].mxu1 }
  0xe7   :  { %v181_v47 = vpop.f32.mrb[6].mxu0  ;;  %v227_v48 = vpop.f32.mrb[6].mxu1 }
  0xe8   :  { %v1013_v49 = vpop.f32.mrb[7].mxu0  ;;  %v1019_v50 = vpop.f32.mrb[7].mxu1  ;;  %v432_v51 = vsel %vm424_vm2, -1e+12, %v416_v43  ;;  %v433_v52 = vsel %vm425_vm3, -1e+12, %v417_v45 }
  0xe9   :  { %v444_v53 = vsel %vm45_vm0, %v432_v51, -inf  ;;  %v447_v54 = vsel %vm45_vm0, %v433_v52, -inf }
  0xea   :  { %445 = vmax.xlane.f32.xlu1 %v444_v53 }
  0xed   :  { %v270_v55 = vpop.f32.mrb[8].mxu0  ;;  %v316_v56 = vpop.f32.mrb[8].mxu1 }
  0xee   :  { %v418_v57 = vmul.f32 0.35355338, %v270_v55  ;;  %v419_v58 = vmul.f32 0.35355338, %v316_v56  ;;  %448 = vmax.xlane.f32.xlu1 %v447_v54  ;;  %v1024_v59 = vpop.f32.mrb[9].mxu0  ;;  %v1030_v60 = vpop.f32.mrb[9].mxu1 }
  0xef   :  { %v273_v61 = vpop.f32.mrb[10].mxu0  ;;  %v319_v62 = vpop.f32.mrb[10].mxu1  ;;  %v37_v60 = vld [vmem:[%s1455_s2] sm:$0xf] }
  0xf0   :  { %v1031_v63 = vpop.f32.mrb[11].mxu1  ;;  %v435_v0 = vsel %vm425_vm3, -1e+12, %v419_v58  ;;  %v434_v1 = vsel %vm424_vm2, -1e+12, %v418_v57  ;;  %v1025_v3 = vpop.f32.mrb[11].mxu0 }
  0xf1   :  { %v453_v4 = vsel %vm45_vm0, %v435_v0, -inf  ;;  %v450_v5 = vsel %vm45_vm0, %v434_v1, -inf  ;;  %v547_v61 = vsel %vm545_vm4, %v37_v60, 0  ;;  %v38_v62 = vld [vmem:[%s1455_s2 + $0x4] sm:$0xf] }
  0xf2   :  { %454 = vmax.xlane.f32.xlu1 %v453_v4  ;;  %451 = vmax.xlane.f32.xlu0 %v450_v5  ;;  %v593_v63 = vsel %vm545_vm4, %v38_v62, 0  ;;  %v39_v5 = vld [vmem:[%s1455_s2 + $0x8] sm:$0xf] }
  0xf3   :  { %1045 = vmatpush3.bf16.msra.mxu0 %v547_v61  ;;  %1051 = vmatpush3.bf16.msra.mxu1 %v593_v63 }
  0xf4   :  { %1056 = vmatprep.subr.bf16.mxu0 %v1153_v2  ;;  %1062 = vmatprep.subr.bf16.mxu1 %v1153_v2 }
  0xf5   :  { %v362_v6 = vpop.f32.mrb[12].mxu0  ;;  %v408_v7 = vpop.f32.mrb[12].mxu1 }
  0xf6   :  { %v420_v8 = vmul.f32 0.35355338, %v362_v6  ;;  %v421_v9 = vmul.f32 0.35355338, %v408_v7  ;;  %v1036_v10 = vpop.f32.mrb[13].mxu0  ;;  %v1042_v11 = vpop.f32.mrb[13].mxu1 }
  0xf7   :  { %v365_v12 = vpop.f32.mrb[14].mxu0  ;;  %v411_v13 = vpop.f32.mrb[14].mxu1  ;;  %v40_v11 = vld [vmem:[%s1455_s2 + $0xc] sm:$0xf] }
  0xf8   :  { %v1043_v14 = vpop.f32.mrb[15].mxu1  ;;  %v437_v15 = vsel %vm425_vm3, -1e+12, %v421_v9  ;;  %v436_v16 = vsel %vm424_vm2, -1e+12, %v420_v8  ;;  %v1037_v17 = vpop.f32.mrb[15].mxu0 }
  0xf9   :  { %v459_v18 = vsel %vm45_vm0, %v437_v15, -inf  ;;  %v456_v19 = vsel %vm45_vm0, %v436_v16, -inf  ;;  %v639_v9 = vsel %vm545_vm4, %v39_v5, 0 }
  0xfa   :  { %460 = vmax.xlane.f32.xlu1 %v459_v18  ;;  %457 = vmax.xlane.f32.xlu0 %v456_v19  ;;  %v41_v18 = vld [vmem:[%s1455_s2 + $0x10] sm:$0xf] }
 0x16f   :  { %v440_v20 = vpop.xlane.xlu0 %439 }
 0x170   :  { %v462_v21 = vsub.f32 %v430_v37, %v440_v20 }
 0x172   :  { %v470_v22 = vmul.f32 1.442695, %v462_v21  ;;  %v731_v21 = vsel %vm545_vm4, %v41_v18, 0 }
 0x173   :  { %v443_v23 = vpop.xlane.xlu0 %442 }
 0x174   :  { %1097 = vpow2.f32 %v470_v22  ;;  %v463_v24 = vsub.f32 %v431_v38, %v443_v23  ;;  %v42_v23 = vld [vmem:[%s1455_s2 + $0x14] sm:$0xf] }
 0x176   :  { %v472_v27 = vmul.f32 1.442695, %v463_v24 }
 0x177   :  { %v446_v28 = vpop.xlane.xlu1 %445 }
 0x178   :  { %1099 = vpow2.f32 %v472_v27  ;;  %v464_v26 = vsub.f32 %v432_v51, %v446_v28 }
 0x17a   :  { %v474_v29 = vmul.f32 1.442695, %v464_v26 }
 0x17b   :  { %v449_v25 = vpop.xlane.xlu1 %448 }
 0x17c   :  { %1101 = vpow2.f32 %v474_v29  ;;  %v465_v30 = vsub.f32 %v433_v52, %v449_v25  ;;  %v777_v29 = vsel %vm545_vm4, %v42_v23, 0 }
 0x17e   :  { %v1098_v31 = vpop.eup %1097  ;;  %v476_v32 = vmul.f32 1.442695, %v465_v30 }
 0x17f   :  { %v455_v33 = vpop.xlane.xlu1 %454  ;;  %v452_v34 = vpop.xlane.xlu0 %451  ;;  %v486_v35 = vsel %vm45_vm0, %v1098_v31, 0.0 }
 0x180   :  { %1103 = vpow2.f32 %v476_v32  ;;  %v467_v36 = vsub.f32 %v435_v0, %v455_v33  ;;  %v466_v37 = vsub.f32 %v434_v1, %v452_v34  ;;  %487 = vadd.xlane.f32.xlu0 %v486_v35  ;;  %v43_v32 = vld [vmem:[%s1455_s2 + $0x18] sm:$0xf] }
 0x181   :  { %v823_v35 = vsel %vm545_vm4, %v43_v32, 0 }
 0x182   :  { %v1100_v39 = vpop.eup %1099  ;;  %v480_v38 = vmul.f32 1.442695, %v467_v36  ;;  %v478_v40 = vmul.f32 1.442695, %v466_v37  ;;  %v44_v36 = vld [vmem:[%s1455_s2 + $0x1c] sm:$0xf] }
 0x183   :  { %v489_v41 = vsel %vm45_vm0, %v1100_v39, 0.0  ;;  %s1155_s2 = smov [#allocation2]  }
 0x184   :  { %1105 = vpow2.f32 %v480_v38  ;;  %490 = vadd.xlane.f32.xlu1 %v489_v41  ;;  %s935_s17 = sshll.u32 %s1155_s2, 4  ;;  %s936_s17 = int_to_ptr.vmem [resolvable:$true] %s935_s17 }
 0x185   :  { %1107 = vpow2.f32 %v478_v40  ;;  %s1129_s18 = scalar_lea.vmem %s936_s17, 1024  ;;  %p1134_p1 = scmp.lt.s32.totalorder %s936_s17, %s936_s17 }
 0x186   :  { %v1313_v42 = vpop.eup %1101  ;;  %p1130_p0 = scmp.ne.s32.totalorder %s936_s17, %s1129_s18  ;;  %p1135_p2 = scmp.lt.s32.totalorder %s1129_s18, %s1129_s18 }
 0x187   :  { %v461_v43 = vpop.xlane.xlu1 %460  ;;  %v458_v44 = vpop.xlane.xlu0 %457  ;;  %v492_v45 = vsel %vm45_vm0, %v1313_v42, 0.0 }
 0x188   :  { %v469_v46 = vsub.f32 %v437_v15, %v461_v43  ;;  %v468_v47 = vsub.f32 %v436_v16, %v458_v44  ;;  %493 = vadd.xlane.f32.xlu0 %v492_v45  ;;  %v685_v16 = vsel %vm545_vm4, %v40_v11, 0  ;;  %p1136_p3 = por %p1135_p2, %p1134_p1 }
 0x18a   :  { %v1317_v48 = vpop.eup %1103  ;;  %v484_v49 = vmul.f32 1.442695, %v469_v46  ;;  %v482_v50 = vmul.f32 1.442695, %v468_v47  ;;  %p1137_p4 = pnand %p1136_p3, %p1130_p0 }
 0x18b   :  { %v495_v51 = vsel %vm45_vm0, %v1317_v48, 0.0 }
 0x18c   :  { %1109 = vpow2.f32 %v484_v49  ;;  %496 = vadd.xlane.f32.xlu1 %v495_v51 }
 0x18d   :  { %1111 = vpow2.f32 %v482_v50 }
 0x18e   :  { %v1321_v52 = vpop.eup %1105 }
 0x18f   :  { %v1323_v53 = vpop.eup %1107  ;;  %v501_v54 = vsel %vm45_vm0, %v1321_v52, 0.0 }
 0x190   :  { %502 = vadd.xlane.f32.xlu1 %v501_v54  ;;  %v498_v55 = vsel %vm45_vm0, %v1323_v53, 0.0 }
 0x191   :  { %499 = vadd.xlane.f32.xlu0 %v498_v55 }
 0x196   :  { %v1329_v56 = vpop.eup %1109 }
 0x197   :  { %v1331_v57 = vpop.eup %1111  ;;  %v507_v58 = vsel %vm45_vm0, %v1329_v56, 0.0 }
 0x198   :  { %508 = vadd.xlane.f32.xlu1 %v507_v58  ;;  %v504_v59 = vsel %vm45_vm0, %v1331_v57, 0.0 }
 0x199   :  { %505 = vadd.xlane.f32.xlu0 %v504_v59 }
 0x20d   :  { %v488_v0 = vpop.xlane.xlu0 %487 }
 0x20e   :  { %1113 = vrcp.f32 %v488_v0 }
 0x211   :  { %v491_v1 = vpop.xlane.xlu1 %490 }
 0x212   :  { %1115 = vrcp.f32 %v491_v1 }
 0x215   :  { %v494_v3 = vpop.xlane.xlu0 %493 }
 0x216   :  { %1117 = vrcp.f32 %v494_v3 }
 0x218   :  { %v1114_v4 = vpop.eup %1113 }
 0x219   :  { %v518_v6 = vmul.f32 %v1114_v4, %v1098_v31  ;;  %v497_v7 = vpop.xlane.xlu1 %496 }
 0x21a   :  { %1119 = vrcp.f32 %v497_v7 }
 0x21b   :  { %526 = vst.msk [vmem:[#allocation2] sm:$0xff] %vm45_vm0, %v518_v6  ;;  %v534_v8 = vpack.c.bf16 %v518_v6, %v518_v6 }
 0x21c   :  { %v1116_v10 = vpop.eup %1115 }
 0x21d   :  { %v519_v12 = vmul.f32 %v1116_v10, %v1100_v39  ;;  %v503_v13 = vpop.xlane.xlu1 %502  ;;  %1047 = vmatmul.mubr.msk.bf16.vlgmr.msra.gmra.mrb[16].mxu0 %vm45_vm0, %v534_v8  ;;  %v869_v39 = vsel %vm545_vm4, %v44_v36, 0 }
 0x21e   :  { %1121 = vrcp.f32 %v503_v13  ;;  %v500_v14 = vpop.xlane.xlu0 %499  ;;  %1057 = vmatpush3.bf16.msra.mxu0 %v639_v9  ;;  %1058 = vmatprep.mubr.msk.bf16.mxu0 %vm1154_vm1, %v1153_v2 }
 0x21f   :  { %527 = vst.msk [vmem:[#allocation2 + $0x8] sm:$0xff] %vm45_vm0, %v519_v12  ;;  %1123 = vrcp.f32 %v500_v14  ;;  %v535_v15 = vpack.c.bf16 %v519_v12, %v519_v12  ;;  %1068 = vmatprep.subr.bf16.mxu0 %v1153_v2 }
 0x220   :  { %v1118_v17 = vpop.eup %1117 }
 0x221   :  { %v520_v19 = vmul.f32 %v1118_v17, %v1313_v42  ;;  %1053 = vmatmul.mubr.msk.bf16.vlgmr.msra.gmra.mrb[16].mxu1 %vm45_vm0, %v535_v15 }
 0x222   :  { %1063 = vmatpush3.bf16.msra.mxu1 %v685_v16  ;;  %1064 = vmatprep.mubr.msk.bf16.mxu1 %vm1154_vm1, %v1153_v2 }
 0x223   :  { %528 = vst.msk [vmem:[#allocation2 + $0x10] sm:$0xff] %vm45_vm0, %v520_v19  ;;  %v536_v20 = vpack.c.bf16 %v520_v19, %v520_v19  ;;  %1074 = vmatprep.subr.bf16.mxu1 %v1153_v2 }
 0x224   :  { %v1120_v22 = vpop.eup %1119 }
 0x225   :  { %v521_v24 = vmul.f32 %v1120_v22, %v1317_v48  ;;  %v509_v27 = vpop.xlane.xlu1 %508  ;;  %1059 = vmatmul.mubr.msk.bf16.vlgmr.msra.gmra.mrb[20].mxu0 %vm45_vm0, %v536_v20 }
 0x226   :  { %1125 = vrcp.f32 %v509_v27  ;;  %v506_v28 = vpop.xlane.xlu0 %505  ;;  %1069 = vmatpush3.bf16.msra.mxu0 %v731_v21  ;;  %1070 = vmatprep.mubr.msk.bf16.mxu0 %vm1154_vm1, %v1153_v2 }
 0x227   :  { %529 = vst.msk [vmem:[#allocation2 + $0x18] sm:$0xff] %vm45_vm0, %v521_v24  ;;  %1127 = vrcp.f32 %v506_v28  ;;  %v537_v26 = vpack.c.bf16 %v521_v24, %v521_v24  ;;  %1080 = vmatprep.subr.bf16.mxu0 %v1153_v2 }
 0x228   :  { %v1122_v25 = vpop.eup %1121 }
 0x229   :  { %v1124_v30 = vpop.eup %1123  ;;  %v523_v31 = vmul.f32 %v1122_v25, %v1321_v52  ;;  %1065 = vmatmul.mubr.msk.bf16.vlgmr.msra.gmra.mrb[20].mxu1 %vm45_vm0, %v537_v26 }
 0x22a   :  { %v522_v33 = vmul.f32 %v1124_v30, %v1323_v53  ;;  %1075 = vmatpush3.bf16.msra.mxu1 %v777_v29  ;;  %1076 = vmatprep.mubr.msk.bf16.mxu1 %vm1154_vm1, %v1153_v2 }
 0x22b   :  { %531 = vst.msk [vmem:[#allocation2 + $0x28] sm:$0xff] %vm45_vm0, %v523_v31  ;;  %1086 = vmatprep.subr.bf16.mxu1 %v1153_v2  ;;  %v539_v37 = vpack.c.bf16 %v523_v31, %v523_v31 }
 0x22c   :  { %530 = vst.msk [vmem:[#allocation2 + $0x20] sm:$0xff] %vm45_vm0, %v522_v33  ;;  %v538_v34 = vpack.c.bf16 %v522_v33, %v522_v33 }
 0x22e   :  { %1071 = vmatmul.mubr.msk.bf16.vlgmr.msra.gmra.mrb[24].mxu0 %vm45_vm0, %v538_v34 }
 0x22f   :  { %1081 = vmatpush3.bf16.msra.mxu0 %v823_v35  ;;  %1082 = vmatprep.mubr.msk.bf16.mxu0 %vm1154_vm1, %v1153_v2 }
 0x230   :  { %v1126_v38 = vpop.eup %1125 }
 0x231   :  { %v1128_v40 = vpop.eup %1127  ;;  %v525_v41 = vmul.f32 %v1126_v38, %v1329_v56  ;;  %1077 = vmatmul.mubr.msk.bf16.vlgmr.msra.gmra.mrb[24].mxu1 %vm45_vm0, %v539_v37 }
 0x232   :  { %v524_v42 = vmul.f32 %v1128_v40, %v1331_v57  ;;  %1087 = vmatpush3.bf16.msra.mxu1 %v869_v39  ;;  %1088 = vmatprep.mubr.msk.bf16.mxu1 %vm1154_vm1, %v1153_v2 }
 0x233   :  { %533 = vst.msk [vmem:[#allocation2 + $0x38] sm:$0xff] %vm45_vm0, %v525_v41  ;;  %v541_v44 = vpack.c.bf16 %v525_v41, %v525_v41 }
 0x234   :  { %532 = vst.msk [vmem:[#allocation2 + $0x30] sm:$0xff] %vm45_vm0, %v524_v42  ;;  %v540_v43 = vpack.c.bf16 %v524_v42, %v524_v42 }
 0x236   :  { %1083 = vmatmul.mubr.msk.bf16.vlgmr.msra.gmra.mrb[28].mxu0 %vm45_vm0, %v540_v43 }
 0x239   :  { %1089 = vmatmul.mubr.msk.bf16.vlgmr.msra.gmra.mrb[28].mxu1 %vm45_vm0, %v541_v44 }
 0x23a   :  { %1140 = shalt.err (!%p1137_p4)
}
 0x23b   :  { %s1141_s1 = scalar_lea.hbm %s1458_s5, 1024 }
 0x23c   :  { %p1142_p5 = scmp.ne.s32.totalorder %s1458_s5, %s1141_s1  ;;  %p1145_p6 = scmp.lt.u32.totalorder %s1141_s1, %s1458_s5 }
 0x23e   :  { %p1147_p7 = pnand %p1145_p6, %p1142_p5 }
 0x240   :  { %1150 = shalt.err (!%p1147_p7)
}
 0x241   :  { %s1156_s25 = smov 128   ;;  %s1157_s26 = smov 8   ;;  %vm919_vm5 = vcmask 60416  }
 0x242   :  { %941 = dma.vmem_to_hbm [thread:$0]  %s936_s17, 1024, %s1458_s5, [#allocation3], %s1156_s25, %s1156_s25, %s1157_s26  }
 0x2f0   :  { %v583_v2 = vpop.f32.mrb[16].mxu0 }
 0x2f1   :  { %v911_v45 = vpack.c.bf16 %v583_v2, %v583_v2  ;;  %v1048_v46 = vpop.f32.mrb[17].mxu0 }
 0x2f2   :  { %v586_v47 = vpop.f32.mrb[18].mxu0 }
 0x2f3   :  { %920 = vst.msk [vmem:[%s1457_s4] sm:$0xf] %vm919_vm5, %v911_v45  ;;  %v1049_v48 = vpop.f32.mrb[19].mxu0 }
 0x2f4   :  { %v629_v49 = vpop.f32.mrb[16].mxu1 }
 0x2f5   :  { %v912_v50 = vpack.c.bf16 %v629_v49, %v629_v49  ;;  %v1054_v51 = vpop.f32.mrb[17].mxu1 }
 0x2f6   :  { %v632_v52 = vpop.f32.mrb[18].mxu1 }
 0x2f7   :  { %921 = vst.msk [vmem:[%s1457_s4 + $0x4] sm:$0xf] %vm919_vm5, %v912_v50  ;;  %v1055_v53 = vpop.f32.mrb[19].mxu1 }
 0x2f8   :  { %v675_v54 = vpop.f32.mrb[20].mxu0 }
 0x2f9   :  { %v913_v55 = vpack.c.bf16 %v675_v54, %v675_v54  ;;  %v1060_v56 = vpop.f32.mrb[21].mxu0 }
 0x2fa   :  { %v678_v57 = vpop.f32.mrb[22].mxu0 }
 0x2fb   :  { %922 = vst.msk [vmem:[%s1457_s4 + $0x8] sm:$0xf] %vm919_vm5, %v913_v55  ;;  %v1061_v58 = vpop.f32.mrb[23].mxu0 }
 0x2fc   :  { %v721_v59 = vpop.f32.mrb[20].mxu1 }
 0x2fd   :  { %v914_v60 = vpack.c.bf16 %v721_v59, %v721_v59  ;;  %v1066_v61 = vpop.f32.mrb[21].mxu1 }
 0x2fe   :  { %v724_v62 = vpop.f32.mrb[22].mxu1 }
 0x2ff   :  { %923 = vst.msk [vmem:[%s1457_s4 + $0xc] sm:$0xf] %vm919_vm5, %v914_v60  ;;  %v1067_v63 = vpop.f32.mrb[23].mxu1 }
 0x301   :  { %v767_v0 = vpop.f32.mrb[24].mxu0 }
 0x302   :  { %v915_v1 = vpack.c.bf16 %v767_v0, %v767_v0  ;;  %v1072_v3 = vpop.f32.mrb[25].mxu0 }
 0x303   :  { %v770_v4 = vpop.f32.mrb[26].mxu0 }
 0x304   :  { %924 = vst.msk [vmem:[%s1457_s4 + $0x10] sm:$0xf] %vm919_vm5, %v915_v1  ;;  %v1073_v5 = vpop.f32.mrb[27].mxu0  ;;  %v813_v6 = vpop.f32.mrb[24].mxu1 }
 0x305   :  { %v916_v7 = vpack.c.bf16 %v813_v6, %v813_v6  ;;  %v1078_v8 = vpop.f32.mrb[25].mxu1 }
 0x306   :  { %v816_v9 = vpop.f32.mrb[26].mxu1 }
 0x307   :  { %925 = vst.msk [vmem:[%s1457_s4 + $0x14] sm:$0xf] %vm919_vm5, %v916_v7  ;;  %v1079_v10 = vpop.f32.mrb[27].mxu1 }
 0x309   :  { %v859_v11 = vpop.f32.mrb[28].mxu0 }
 0x30a   :  { %v917_v12 = vpack.c.bf16 %v859_v11, %v859_v11  ;;  %v1084_v13 = vpop.f32.mrb[29].mxu0 }
 0x30b   :  { %v862_v14 = vpop.f32.mrb[30].mxu0 }
 0x30c   :  { %926 = vst.msk [vmem:[%s1457_s4 + $0x18] sm:$0xf] %vm919_vm5, %v917_v12  ;;  %v1085_v15 = vpop.f32.mrb[31].mxu0  ;;  %v905_v16 = vpop.f32.mrb[28].mxu1 }
 0x30d   :  { %v918_v17 = vpack.c.bf16 %v905_v16, %v905_v16  ;;  %v1090_v18 = vpop.f32.mrb[29].mxu1 }
 0x30e   :  { %v908_v19 = vpop.f32.mrb[30].mxu1 }
 0x30f   :  { %927 = vst.msk [vmem:[%s1457_s4 + $0x1c] sm:$0xf] %vm919_vm5, %v918_v17  ;;  %v1091_v20 = vpop.f32.mrb[31].mxu1 }
 0x310   :  { %1151 = dma.done.wait [#allocation3], 1024  }
 0x311   :  { %1152 = vsyncadd [#allocation3], 4294966272 }
 0x312   :  { %947 = vsyncpa [#allocation3], 1 }

</bundles_post_ra>
